<compile_context>
chip_gen: v5e
topology: v5e:2x2
jax: 0.10.0
libtpu: 0.0.40
codegen_flags: <defaults>
</compile_context>

<pallas_src>
import jax
import jax.numpy as jnp
from jax.experimental import pallas as pl
from jax.experimental.pallas import tpu as pltpu

HIDDEN = 512
LANE = 128
TILE_N_MAX = 1024   # multiple of 256 (v6e/v7x MXU rows) and 128 (v5e MXU rows)


def _round_up(n, m):
    return ((n + m - 1) // m) * m


def _choose_tile(n):
    """Pick the batch tile.

    Small batches get a tile proportional to N (16-row granularity for bf16
    sublane packing); larger batches get big tiles (amortize per-step overhead)
    but clamped so the grid has at least 2 steps for v7x dual-TensorCore use.
    """
    if n <= 128:
        return _round_up(max(n, 1), 16)
    half = _round_up(-(-n // 2), 256)            # ceil(n/2) rounded to 256
    return max(256, min(TILE_N_MAX, half))


def _embedding_kernel(x_ref, w1_ref, b1_ref, w2_ref, b2_ref, o_ref):
    # relu(x @ w1 + b1) @ w2 + b2   (BN affines already folded into w*/b*)
    h = jnp.dot(x_ref[...], w1_ref[...], preferred_element_type=jnp.float32)
    h = jnp.maximum(h + b1_ref[...], 0.0)
    o = jnp.dot(h.astype(w2_ref.dtype), w2_ref[...],
                preferred_element_type=jnp.float32)
    o_ref[...] = (o + b2_ref[...]).astype(o_ref.dtype)


def embedding_forward(x, params, out_dtype=jnp.bfloat16, keep_padded=False):
    """x: (N, in_dim) float32. params: from make_params (BN-folded, padded, bf16).

    Returns (N, out_dim) in `out_dtype`.  With keep_padded=True the padded
    (n_pad, out_pad) slab is returned instead (rows >= N contain garbage
    relu(b1')@w2'+b2' values and must be ignored by the caller).
    """
    N, in_dim = x.shape
    w1, b1, w2, b2 = params["w1"], params["b1"], params["w2"], params["b2"]
    in_pad = w1.shape[0]
    out_pad = w2.shape[1]
    out_dim = params["out_dim"]

    tile = _choose_tile(N)
    n_pad = _round_up(max(N, 1), tile)

    xb = x.astype(jnp.bfloat16)
    if (n_pad != N) or (in_pad != in_dim):
        # Single fused pad; skipped entirely when shapes already match.
        xb = jnp.pad(xb, ((0, n_pad - N), (0, in_pad - in_dim)))

    grid = (n_pad // tile,)
    out_itemsize = jnp.dtype(out_dtype).itemsize
    flops = 2 * n_pad * (in_pad * HIDDEN + HIDDEN * out_pad)
    bytes_accessed = (xb.size * 2 + n_pad * out_pad * out_itemsize
                      + w1.size * 2 + w2.size * 2 + b1.size * 4 + b2.size * 4)

    out = pl.pallas_call(
        _embedding_kernel,
        out_shape=jax.ShapeDtypeStruct((n_pad, out_pad), out_dtype),
        grid=grid,
        in_specs=[
            pl.BlockSpec((tile, in_pad), lambda i: (i, 0)),     # streamed x tile
            pl.BlockSpec((in_pad, HIDDEN), lambda i: (0, 0)),   # resident w1
            pl.BlockSpec((1, HIDDEN), lambda i: (0, 0)),        # resident b1
            pl.BlockSpec((HIDDEN, out_pad), lambda i: (0, 0)),  # resident w2
            pl.BlockSpec((1, out_pad), lambda i: (0, 0)),       # resident b2
        ],
        out_specs=pl.BlockSpec((tile, out_pad), lambda i: (i, 0)),
        compiler_params=pltpu.CompilerParams(
            dimension_semantics=("parallel",),
            vmem_limit_bytes=32 * 1024 * 1024),
        cost_estimate=pl.CostEstimate(
            flops=flops, transcendentals=0, bytes_accessed=bytes_accessed),
    )(xb, w1, b1, w2, b2)

    if keep_padded or (N == n_pad and out_dim == out_pad):
        return out                              # no extra HBM pass for slicing
    return out[:N, :out_dim]


def make_params(key, in_dim, out_dim, hidden=HIDDEN, eps=1e-5):
    """Synthetic PyTorch-equivalent params + BN-folded / padded / bf16 kernel params."""
    ks = jax.random.split(key, 12)
    # BatchNorm1d(in_dim): gamma, beta, running_mean, running_var
    g1 = 1.0 + 0.1 * jax.random.normal(ks[0], (in_dim,), jnp.float32)
    be1 = 0.1 * jax.random.normal(ks[1], (in_dim,), jnp.float32)
    rm1 = 0.05 * jax.random.normal(ks[2], (in_dim,), jnp.float32)
    rv1 = jnp.abs(1.0 + 0.1 * jax.random.normal(ks[3], (in_dim,), jnp.float32))
    # BatchNorm1d(hidden)
    g2 = 1.0 + 0.1 * jax.random.normal(ks[4], (hidden,), jnp.float32)
    be2 = 0.1 * jax.random.normal(ks[5], (hidden,), jnp.float32)
    rm2 = 0.05 * jax.random.normal(ks[6], (hidden,), jnp.float32)
    rv2 = jnp.abs(1.0 + 0.1 * jax.random.normal(ks[7], (hidden,), jnp.float32))
    # Linear1 (in_dim -> hidden), Linear2 (hidden -> out_dim); stored as (in, out)
    w1 = (jax.random.normal(ks[8], (in_dim, hidden), jnp.float32)
          / jnp.sqrt(jnp.float32(in_dim)))
    b1 = 0.01 * jax.random.normal(ks[9], (hidden,), jnp.float32)
    w2 = (jax.random.normal(ks[10], (hidden, out_dim), jnp.float32)
          / jnp.sqrt(jnp.float32(hidden)))
    b2 = 0.01 * jax.random.normal(ks[11], (out_dim,), jnp.float32)

    raw = dict(g1=g1, be1=be1, rm1=rm1, rv1=rv1,
               g2=g2, be2=be2, rm2=rm2, rv2=rv2,
               w1=w1, b1=b1, w2=w2, b2=b2, eps=eps)

    # Fold inference-mode BN affines into the adjacent Linear layers (exact, f32).
    s1 = g1 / jnp.sqrt(rv1 + eps)
    t1 = be1 - rm1 * s1
    s2 = g2 / jnp.sqrt(rv2 + eps)
    t2 = be2 - rm2 * s2
    w1f = s1[:, None] * w1            # (x*s1+t1) @ w1 + b1 == x @ w1f + b1f
    b1f = b1 + t1 @ w1
    w2f = s2[:, None] * w2            # (h*s2+t2) @ w2 + b2 == h @ w2f + b2f
    b2f = b2 + t2 @ w2

    # Lane-pad in/out feature dims to multiples of 128; weights to bf16.
    in_pad = _round_up(in_dim, LANE)
    out_pad = _round_up(out_dim, LANE)
    w1p = jnp.zeros((in_pad, hidden), jnp.float32).at[:in_dim, :].set(w1f)
    w2p = jnp.zeros((hidden, out_pad), jnp.float32).at[:, :out_dim].set(w2f)
    b2p = jnp.zeros((out_pad,), jnp.float32).at[:out_dim].set(b2f)

    params = {
        "w1": w1p.astype(jnp.bfloat16),
        "b1": b1f.reshape(1, hidden).astype(jnp.float32),
        "w2": w2p.astype(jnp.bfloat16),
        "b2": b2p.reshape(1, out_pad).astype(jnp.float32),
        "out_dim": out_dim,
    }
    return params, raw


def reference_forward(x, raw):
    """Pure-JAX f32 reference of the PyTorch module in eval mode."""
    eps = raw["eps"]
    h = (x - raw["rm1"]) / jnp.sqrt(raw["rv1"] + eps) * raw["g1"] + raw["be1"]
    h = jnp.maximum(h @ raw["w1"] + raw["b1"], 0.0)
    h = (h - raw["rm2"]) / jnp.sqrt(raw["rv2"] + eps) * raw["g2"] + raw["be2"]
    return h @ raw["w2"] + raw["b2"]


if __name__ == "__main__":
    key = jax.random.PRNGKey(0)
    in_dim, out_dim = 32, 64
    kx1, kx2, kp = jax.random.split(key, 3)
    params, raw = make_params(kp, in_dim, out_dim)

    # Case 1: tiny batch (small-batch latency path, single grid step).
    N1 = 8
    x1 = jax.random.normal(kx1, (N1, in_dim), jnp.float32)
    out1 = jax.block_until_ready(embedding_forward(x1, params))
    ref1 = reference_forward(x1, raw)
    assert out1.shape == (N1, out_dim)
    err1 = float(jnp.max(jnp.abs(out1.astype(jnp.float32) - ref1)))
    # bf16 operands + bf16 output vs f32 reference -> relaxed tolerance.
    assert jnp.allclose(out1.astype(jnp.float32), ref1, atol=1e-1, rtol=1e-1), \
        f"case1 max abs err {err1}"

    # Case 2: larger batch (multi-step grid, megacore-shardable batch axis).
    N2 = 600
    x2 = jax.random.normal(kx2, (N2, in_dim), jnp.float32)
    out2 = jax.block_until_ready(embedding_forward(x2, params))
    ref2 = reference_forward(x2, raw)
    assert out2.shape == (N2, out_dim)
    err2 = float(jnp.max(jnp.abs(out2.astype(jnp.float32) - ref2)))
    assert jnp.allclose(out2.astype(jnp.float32), ref2, atol=1e-1, rtol=1e-1), \
        f"case2 max abs err {err2}"

    print("KERNEL_OK")
</pallas_src>

<mosaic_0001>
module attributes {stable_mosaic.version = 11 : i64} {
  func.func @_embedding_kernel(%arg0: i32, %arg1: memref<16x128xbf16, #tpu.memory_space<vmem>>, %arg2: memref<128x512xbf16, #tpu.memory_space<vmem>>, %arg3: memref<1x512xf32, #tpu.memory_space<vmem>>, %arg4: memref<512x128xbf16, #tpu.memory_space<vmem>>, %arg5: memref<1x128xf32, #tpu.memory_space<vmem>>, %arg6: memref<16x128xbf16, #tpu.memory_space<vmem>>) attributes {dimension_semantics = [#tpu.dimension_semantics<parallel>], iteration_bounds = array<i64: 1>, scalar_prefetch = 0 : i64, scratch_operands = 0 : i64, tpu.core_type = #tpu.core_type<tc>, window_params = [{transform_indices = @transform_0, window_bounds = array<i64: 16, 128>}, {pipeline_mode = #tpu.pipeline_mode<synchronous>, transform_indices = @transform_1, window_bounds = array<i64: 128, 512>}, {pipeline_mode = #tpu.pipeline_mode<synchronous>, transform_indices = @transform_2, window_bounds = array<i64: 1, 512>}, {pipeline_mode = #tpu.pipeline_mode<synchronous>, transform_indices = @transform_3, window_bounds = array<i64: 512, 128>}, {pipeline_mode = #tpu.pipeline_mode<synchronous>, transform_indices = @transform_4, window_bounds = array<i64: 1, 128>}, {transform_indices = @transform_5, window_bounds = array<i64: 16, 128>}]} {
    %c0 = arith.constant 0 : index
    %c0_0 = arith.constant 0 : index
    %0 = vector.load %arg1[%c0, %c0_0] : memref<16x128xbf16, #tpu.memory_space<vmem>>, vector<16x128xbf16>
    %c0_1 = arith.constant 0 : index
    %c0_2 = arith.constant 0 : index
    %1 = vector.load %arg2[%c0_1, %c0_2] : memref<128x512xbf16, #tpu.memory_space<vmem>>, vector<128x512xbf16>
    %cst = arith.constant dense<0.000000e+00> : vector<16x512xf32>
    %2 = tpu.matmul %0, %1, %cst {dimension_numbers = #tpu.dot_dimension_numbers<[1], [0], [0], [1], [0, 0, 1, 1], [], []>} : vector<16x128xbf16>, vector<128x512xbf16>, vector<16x512xf32> -> vector<16x512xf32>
    %c0_3 = arith.constant 0 : index
    %c0_4 = arith.constant 0 : index
    %3 = vector.load %arg3[%c0_3, %c0_4] : memref<1x512xf32, #tpu.memory_space<vmem>>, vector<1x512xf32>
    %4 = vector.broadcast %3 : vector<1x512xf32> to vector<16x512xf32>
    %5 = arith.addf %2, %4 : vector<16x512xf32>
    %cst_5 = arith.constant 0.000000e+00 : f32
    %6 = vector.broadcast %cst_5 : f32 to vector<16x512xf32>
    %7 = arith.maximumf %5, %6 : vector<16x512xf32>
    %8 = arith.truncf %7 : vector<16x512xf32> to vector<16x512xbf16>
    %c0_6 = arith.constant 0 : index
    %c0_7 = arith.constant 0 : index
    %9 = vector.load %arg4[%c0_6, %c0_7] : memref<512x128xbf16, #tpu.memory_space<vmem>>, vector<512x128xbf16>
    %cst_8 = arith.constant dense<0.000000e+00> : vector<16x128xf32>
    %10 = tpu.matmul %8, %9, %cst_8 {dimension_numbers = #tpu.dot_dimension_numbers<[1], [0], [0], [1], [0, 0, 1, 1], [], []>} : vector<16x512xbf16>, vector<512x128xbf16>, vector<16x128xf32> -> vector<16x128xf32>
    %c0_9 = arith.constant 0 : index
    %c0_10 = arith.constant 0 : index
    %11 = vector.load %arg5[%c0_9, %c0_10] : memref<1x128xf32, #tpu.memory_space<vmem>>, vector<1x128xf32>
    %12 = vector.broadcast %11 : vector<1x128xf32> to vector<16x128xf32>
    %13 = arith.addf %10, %12 : vector<16x128xf32>
    %14 = arith.truncf %13 : vector<16x128xf32> to vector<16x128xbf16>
    %c0_11 = arith.constant 0 : index
    %c0_12 = arith.constant 0 : index
    %15 = vector.load %arg6[%c0_11, %c0_12] : memref<16x128xbf16, #tpu.memory_space<vmem>>, vector<16x128xbf16>
    tpu.vector_store %arg6[%c0_11, %c0_12], %14 {strides = array<i32>} : memref<16x128xbf16, #tpu.memory_space<vmem>>, vector<16x128xbf16>,
    return
  }
  func.func @transform_0(%arg0: i32) -> (i32, i32) {
    %c0_i32 = arith.constant 0 : i32
    %c0_i32_0 = arith.constant 0 : i32
    return %arg0, %c0_i32 : i32, i32
  }
  func.func @transform_1(%arg0: i32) -> (i32, i32) {
    %c0_i32 = arith.constant 0 : i32
    %c0_i32_0 = arith.constant 0 : i32
    %c0_i32_1 = arith.constant 0 : i32
    return %c0_i32, %c0_i32_0 : i32, i32
  }
  func.func @transform_2(%arg0: i32) -> (i32, i32) {
    %c0_i32 = arith.constant 0 : i32
    %c0_i32_0 = arith.constant 0 : i32
    %c0_i32_1 = arith.constant 0 : i32
    return %c0_i32, %c0_i32_0 : i32, i32
  }
  func.func @transform_3(%arg0: i32) -> (i32, i32) {
    %c0_i32 = arith.constant 0 : i32
    %c0_i32_0 = arith.constant 0 : i32
    %c0_i32_1 = arith.constant 0 : i32
    return %c0_i32, %c0_i32_0 : i32, i32
  }
  func.func @transform_4(%arg0: i32) -> (i32, i32) {
    %c0_i32 = arith.constant 0 : i32
    %c0_i32_0 = arith.constant 0 : i32
    %c0_i32_1 = arith.constant 0 : i32
    return %c0_i32, %c0_i32_0 : i32, i32
  }
  func.func @transform_5(%arg0: i32) -> (i32, i32) {
    %c0_i32 = arith.constant 0 : i32
    %c0_i32_0 = arith.constant 0 : i32
    return %arg0, %c0_i32 : i32, i32
  }
}

</mosaic_0001>

<bundles_post_ra>
// kernel: tpu_custom_call.1
= control target key start
LH: loop header
LB: loop body
LE: loop exit
PB: predicated region body
PF: predicated region fallthrough
CT: control target
= control target key end

     0   :  { %10 = vsyncpa [#allocation3], 0  ;;  %s1235_s0 = inlined_call_operand.hbm [shape: bf16[16,128], index: 0, kind: input, shape index: {}]   ;;  %s1236_s1 = inlined_call_operand.hbm [shape: bf16[128,512], index: 1, kind: input, shape index: {}]   ;;  %s1237_s2 = inlined_call_operand.hbm [shape: f32[1,512], index: 2, kind: input, shape index: {}]   ;;  %s1238_s3 = inlined_call_operand.hbm [shape: bf16[512,128], index: 3, kind: input, shape index: {}]   ;;  %s1239_s4 = inlined_call_operand.vmem [shape: f32[1,128], index: 4, kind: input, shape index: {}]   ;;  %s1240_s5 = inlined_call_operand.hbm [shape: bf16[16,128], index: 5, kind: output, shape index: {}]  }
   0x1   :  { %11 = vsyncpa [#allocation6], 0 }
   0x2   :  { %12 = vsyncpa [#allocation9], 0  ;;  %s31_s20 = sshll.u32 %s1236_s1, 4  ;;  %s32_s20 = int_to_ptr.hbm [resolvable:$true] %s31_s20 }
   0x3   :  { %13 = vsyncpa [#allocation4], 0  ;;  %s1169_s21 = smov [#allocation5]   ;;  %s18_s25 = sshll.u32 %s1235_s0, 4  ;;  %s19_s25 = int_to_ptr.hbm [resolvable:$true] %s18_s25 }
   0x4   :  { %s33_s22 = sshll.u32 %s1169_s21, 4  ;;  %s1170_s26 = smov 256   ;;  %s34_s22 = int_to_ptr.vmem [resolvable:$true] %s33_s22 }
   0x5   :  { %s1171_s27 = smov 16   ;;  %s1172_s28 = smov [#allocation2]  }
   0x6   :  { %39 = dma.hbm_to_vmem [thread:$0]  %s32_s20, 4096, %s34_s22, [#allocation6], %s1170_s26, %s1170_s26, %s1171_s27  }
   0x7   :  { %s20_s29 = sshll.u32 %s1172_s28, 4  ;;  %s1173_s30 = smov 64   ;;  %s21_s29 = int_to_ptr.vmem [resolvable:$true] %s20_s29 }
   0x8   :  { %s1174_s6 = smov 4   ;;  %s45_s8 = sshll.u32 %s1237_s2, 4  ;;  %s46_s8 = int_to_ptr.hbm [resolvable:$true] %s45_s8 }
   0x9   :  { %26 = dma.hbm_to_vmem [thread:$0]  %s19_s25, 128, %s21_s29, [#allocation3], %s1173_s30, %s1173_s30, %s1174_s6  }
   0xa   :  { %s1175_s9 = smov [#allocation7]   ;;  %s55_s12 = sshll.u32 %s1238_s3, 4  ;;  %s56_s12 = int_to_ptr.hbm [resolvable:$true] %s55_s12 }
   0xb   :  { %s47_s0 = sshll.u32 %s1175_s9, 4  ;;  %s1176_s13 = smov [#allocation8]   ;;  %s48_s0 = int_to_ptr.vmem [resolvable:$true] %s47_s0 }
   0xc   :  { %50 = dma.hbm_to_vmem [thread:$0]  %s46_s8, 64, %s48_s0, [#allocation6]  }
   0xd   :  { %s57_s14 = sshll.u32 %s1176_s13, 4  ;;  %s58_s14 = int_to_ptr.vmem [resolvable:$true] %s57_s14 }
   0xe   :  { %63 = dma.hbm_to_vmem [thread:$0]  %s56_s12, 4096, %s58_s14, [#allocation9], %s1173_s30, %s1173_s30, %s1174_s6  }
   0xf   :  { %1161 = dma.done.wait [#allocation3], 128  }
  0x10   :  { %1162 = vsyncadd [#allocation3], 4294967168 }
  0x11   :  { %1163 = dma.done.wait [#allocation6], 4160  }
  0x12   :  { %1164 = vsyncadd [#allocation6], 4294963136 }
  0x13   :  { %1165 = dma.done.wait [#allocation9], 4096  }
  0x14   :  { %1166 = vsyncadd [#allocation9], 4294963200  ;;  %v819_v0 = vld [vmem:[#allocation5 + $0xe0] sm:$0xf]  ;;  %v992_v1 = vld [vmem:[#allocation5 + $0xec] sm:$0xf0] }
  0x15   :  { %v990_v2 = vld [vmem:[#allocation5 + $0xe4] sm:$0xf]  ;;  %v820_v3 = vor.u32 %v992_v1, %v819_v0  ;;  %v821_v4 = vld [vmem:[#allocation5 + $0xf0] sm:$0xf0]  ;;  %v827_v5 = vld [vmem:[#allocation5 + $0xe8] sm:$0xf] }
  0x16   :  { %v993_v6 = vld [vmem:[#allocation5 + $0xf4] sm:$0xf0]  ;;  %v824_v7 = vor.u32 %v990_v2, %v821_v4  ;;  %v991_v9 = vld [vmem:[#allocation5 + $0xec] sm:$0xf]  ;;  %v829_v10 = vld [vmem:[#allocation5 + $0xf8] sm:$0xf0] }
  0x17   :  { %v828_v8 = vor.u32 %v993_v6, %v827_v5  ;;  %v803_v11 = vld [vmem:[#allocation5 + $0xc0] sm:$0xf]  ;;  %292 = vmatpush.bf16.msra.mxu0 %v820_v3  ;;  %v832_v12 = vor.u32 %v991_v9, %v829_v10  ;;  %v988_v13 = vld [vmem:[#allocation5 + $0xcc] sm:$0xf0]  ;;  %v986_v14 = vld [vmem:[#allocation5 + $0xc4] sm:$0xf] }
  0x18   :  { %v805_v15 = vld [vmem:[#allocation5 + $0xd0] sm:$0xf0]  ;;  %306 = vmatpush.bf16.msra.mxu1 %v824_v7  ;;  %v804_v16 = vor.u32 %v988_v13, %v803_v11  ;;  %v811_v18 = vld [vmem:[#allocation5 + $0xc8] sm:$0xf]  ;;  %v989_v19 = vld [vmem:[#allocation5 + $0xd4] sm:$0xf0] }
  0x19   :  { %320 = vmatpush.bf16.msra.mxu2 %v828_v8  ;;  %v808_v17 = vor.u32 %v986_v14, %v805_v15  ;;  %v987_v20 = vld [vmem:[#allocation5 + $0xcc] sm:$0xf]  ;;  %334 = vmatpush.bf16.msra.mxu3 %v832_v12  ;;  %v812_v21 = vor.u32 %v989_v19, %v811_v18  ;;  %v813_v22 = vld [vmem:[#allocation5 + $0xd8] sm:$0xf0]  ;;  %v787_v23 = vld [vmem:[#allocation5 + $0xa0] sm:$0xf] }
  0x1a   :  { %v984_v24 = vld [vmem:[#allocation5 + $0xac] sm:$0xf0]  ;;  %v816_v25 = vor.u32 %v987_v20, %v813_v22  ;;  %v982_v26 = vld [vmem:[#allocation5 + $0xa4] sm:$0xf]  ;;  %v789_v27 = vld [vmem:[#allocation5 + $0xb0] sm:$0xf0] }
  0x1b   :  { %v795_v28 = vld [vmem:[#allocation5 + $0xa8] sm:$0xf]  ;;  %293 = vmatpush.bf16.msra.mxu0 %v804_v16  ;;  %v788_v29 = vor.u32 %v984_v24, %v787_v23  ;;  %v985_v30 = vld [vmem:[#allocation5 + $0xb4] sm:$0xf0]  ;;  %v983_v31 = vld [vmem:[#allocation5 + $0xac] sm:$0xf]  ;;  %v792_v33 = vor.u32 %v982_v26, %v789_v27 }
  0x1c   :  { %v797_v32 = vld [vmem:[#allocation5 + $0xb8] sm:$0xf0]  ;;  %307 = vmatpush.bf16.msra.mxu1 %v808_v17  ;;  %v796_v34 = vor.u32 %v985_v30, %v795_v28  ;;  %v771_v35 = vld [vmem:[#allocation5 + $0x80] sm:$0xf]  ;;  %v980_v36 = vld [vmem:[#allocation5 + $0x8c] sm:$0xf0] }
  0x1d   :  { %321 = vmatpush.bf16.msra.mxu2 %v812_v21  ;;  %v978_v37 = vld [vmem:[#allocation5 + $0x84] sm:$0xf]  ;;  %335 = vmatpush.bf16.msra.mxu3 %v816_v25  ;;  %v800_v38 = vor.u32 %v983_v31, %v797_v32  ;;  %v773_v39 = vld [vmem:[#allocation5 + $0x90] sm:$0xf0]  ;;  %v779_v40 = vld [vmem:[#allocation5 + $0x88] sm:$0xf]  ;;  %v772_v44 = vor.u32 %v980_v36, %v771_v35 }
  0x1e   :  { %v981_v41 = vld [vmem:[#allocation5 + $0x94] sm:$0xf0]  ;;  %v979_v42 = vld [vmem:[#allocation5 + $0x8c] sm:$0xf]  ;;  %v781_v43 = vld [vmem:[#allocation5 + $0x98] sm:$0xf0]  ;;  %v776_v45 = vor.u32 %v978_v37, %v773_v39 }
  0x1f   :  { %294 = vmatpush.bf16.msra.mxu0 %v788_v29  ;;  %v780_v46 = vor.u32 %v981_v41, %v779_v40  ;;  %v755_v47 = vld [vmem:[#allocation5 + $0x60] sm:$0xf]  ;;  %v976_v48 = vld [vmem:[#allocation5 + $0x6c] sm:$0xf0]  ;;  %v974_v49 = vld [vmem:[#allocation5 + $0x64] sm:$0xf]  ;;  %v784_v50 = vor.u32 %v979_v42, %v781_v43 }
  0x20   :  { %308 = vmatpush.bf16.msra.mxu1 %v792_v33  ;;  %v757_v51 = vld [vmem:[#allocation5 + $0x70] sm:$0xf0]  ;;  %v763_v52 = vld [vmem:[#allocation5 + $0x68] sm:$0xf]  ;;  %v977_v53 = vld [vmem:[#allocation5 + $0x74] sm:$0xf0]  ;;  %v756_v56 = vor.u32 %v976_v48, %v755_v47 }
  0x21   :  { %322 = vmatpush.bf16.msra.mxu2 %v796_v34  ;;  %336 = vmatpush.bf16.msra.mxu3 %v800_v38  ;;  %v975_v54 = vld [vmem:[#allocation5 + $0x6c] sm:$0xf]  ;;  %v765_v55 = vld [vmem:[#allocation5 + $0x78] sm:$0xf0]  ;;  %v760_v57 = vor.u32 %v974_v49, %v757_v51  ;;  %v764_v58 = vor.u32 %v977_v53, %v763_v52  ;;  %v739_v59 = vld [vmem:[#allocation5 + $0x40] sm:$0xf] }
  0x22   :  { %v972_v60 = vld [vmem:[#allocation5 + $0x4c] sm:$0xf0]  ;;  %v970_v61 = vld [vmem:[#allocation5 + $0x44] sm:$0xf]  ;;  %v768_v62 = vor.u32 %v975_v54, %v765_v55  ;;  %v741_v63 = vld [vmem:[#allocation5 + $0x50] sm:$0xf0] }
  0x23   :  { %295 = vmatpush.bf16.msra.mxu0 %v772_v44  ;;  %v747_v0 = vld [vmem:[#allocation5 + $0x48] sm:$0xf]  ;;  %v973_v1 = vld [vmem:[#allocation5 + $0x54] sm:$0xf0]  ;;  %v971_v2 = vld [vmem:[#allocation5 + $0x4c] sm:$0xf]  ;;  %v740_v4 = vor.u32 %v972_v60, %v739_v59  ;;  %v744_v5 = vor.u32 %v970_v61, %v741_v63 }
  0x24   :  { %309 = vmatpush.bf16.msra.mxu1 %v776_v45  ;;  %v749_v3 = vld [vmem:[#allocation5 + $0x58] sm:$0xf0]  ;;  %v748_v6 = vor.u32 %v973_v1, %v747_v0  ;;  %v723_v7 = vld [vmem:[#allocation5 + $0x20] sm:$0xf]  ;;  %v968_v8 = vld [vmem:[#allocation5 + $0x2c] sm:$0xf0] }
  0x25   :  { %323 = vmatpush.bf16.msra.mxu2 %v780_v46  ;;  %337 = vmatpush.bf16.msra.mxu3 %v784_v50  ;;  %v966_v9 = vld [vmem:[#allocation5 + $0x24] sm:$0xf]  ;;  %v752_v10 = vor.u32 %v971_v2, %v749_v3  ;;  %v725_v11 = vld [vmem:[#allocation5 + $0x30] sm:$0xf0]  ;;  %v731_v12 = vld [vmem:[#allocation5 + $0x28] sm:$0xf]  ;;  %v724_v16 = vor.u32 %v968_v8, %v723_v7 }
  0x26   :  { %v969_v13 = vld [vmem:[#allocation5 + $0x34] sm:$0xf0]  ;;  %v967_v14 = vld [vmem:[#allocation5 + $0x2c] sm:$0xf]  ;;  %v733_v15 = vld [vmem:[#allocation5 + $0x38] sm:$0xf0]  ;;  %v728_v17 = vor.u32 %v966_v9, %v725_v11 }
  0x27   :  { %296 = vmatpush.bf16.msra.mxu0 %v756_v56  ;;  %v732_v18 = vor.u32 %v969_v13, %v731_v12  ;;  %v707_v19 = vld [vmem:[#allocation5] sm:$0xf]  ;;  %v964_v20 = vld [vmem:[#allocation5 + $0xc] sm:$0xf0]  ;;  %v962_v21 = vld [vmem:[#allocation5 + $0x4] sm:$0xf]  ;;  %v736_v22 = vor.u32 %v967_v14, %v733_v15 }
  0x28   :  { %310 = vmatpush.bf16.msra.mxu1 %v760_v57  ;;  %v709_v23 = vld [vmem:[#allocation5 + $0x10] sm:$0xf0]  ;;  %v715_v24 = vld [vmem:[#allocation5 + $0x8] sm:$0xf]  ;;  %v965_v25 = vld [vmem:[#allocation5 + $0x14] sm:$0xf0]  ;;  %v708_v28 = vor.u32 %v964_v20, %v707_v19 }
  0x29   :  { %324 = vmatpush.bf16.msra.mxu2 %v764_v58  ;;  %338 = vmatpush.bf16.msra.mxu3 %v768_v62  ;;  %v963_v26 = vld [vmem:[#allocation5 + $0xc] sm:$0xf]  ;;  %v717_v27 = vld [vmem:[#allocation5 + $0x18] sm:$0xf0]  ;;  %v712_v29 = vor.u32 %v962_v21, %v709_v23  ;;  %v716_v30 = vor.u32 %v965_v25, %v715_v24  ;;  %v1000_v36 = vld [vmem:[#allocation8 + $0x30] sm:$0xff]  ;;  %s1177_s15 = smov [#allocation10]  }
  0x2a   :  { %v720_v31 = vor.u32 %v963_v26, %v717_v27  ;;  %v1001_v32 = vld [vmem:[#allocation8 + $0x38] sm:$0xff]  ;;  %v1008_v38 = vld [vmem:[#allocation8 + $0x70] sm:$0xff]  ;;  %v999_v40 = vld [vmem:[#allocation8 + $0x28] sm:$0xff]  ;;  %s684_s16 = sshll.u32 %s1177_s15, 4  ;;  %s686_s19 = sshll.u32 %s1240_s5, 4  ;;  %s685_s16 = int_to_ptr.vmem [resolvable:$true] %s684_s16  ;;  %s687_s19 = int_to_ptr.hbm [resolvable:$true] %s686_s19 }
  0x2b   :  { %297 = vmatpush.bf16.msra.mxu0 %v740_v4  ;;  %v961_v33 = vld [vmem:[#allocation2] sm:$0xff]  ;;  %v1007_v42 = vld [vmem:[#allocation8 + $0x68] sm:$0xff]  ;;  %v998_v44 = vld [vmem:[#allocation8 + $0x20] sm:$0xff] }
  0x2c   :  { %311 = vmatpush.bf16.msra.mxu1 %v744_v5  ;;  %v1009_v34 = vld [vmem:[#allocation8 + $0x78] sm:$0xff]  ;;  %v1016_v39 = vld [vmem:[#allocation8 + $0xb0] sm:$0xff]  ;;  %v1015_v43 = vld [vmem:[#allocation8 + $0xa8] sm:$0xff] }
  0x2d   :  { %325 = vmatpush.bf16.msra.mxu2 %v748_v6  ;;  %339 = vmatpush.bf16.msra.mxu3 %v752_v10  ;;  %v1017_v35 = vld [vmem:[#allocation8 + $0xb8] sm:$0xff]  ;;  %v1024_v41 = vld [vmem:[#allocation8 + $0xf0] sm:$0xff]  ;;  %v1023_v45 = vld [vmem:[#allocation8 + $0xe8] sm:$0xff] }
  0x2e   :  { %v1025_v37 = vld [vmem:[#allocation8 + $0xf8] sm:$0xff]  ;;  %v1006_v46 = vld [vmem:[#allocation8 + $0x60] sm:$0xff]  ;;  %v996_v51 = vld [vmem:[#allocation8 + $0x10] sm:$0xff] }
  0x2f   :  { %298 = vmatpush.bf16.msra.mxu0 %v724_v16  ;;  %v997_v47 = vld [vmem:[#allocation8 + $0x18] sm:$0xff]  ;;  %v1014_v49 = vld [vmem:[#allocation8 + $0xa0] sm:$0xff]  ;;  %v1004_v52 = vld [vmem:[#allocation8 + $0x50] sm:$0xff] }
  0x30   :  { %312 = vmatpush.bf16.msra.mxu1 %v728_v17  ;;  %v1005_v48 = vld [vmem:[#allocation8 + $0x58] sm:$0xff]  ;;  %v1022_v50 = vld [vmem:[#allocation8 + $0xe0] sm:$0xff]  ;;  %v995_v55 = vld [vmem:[#allocation8 + $0x8] sm:$0xff] }
  0x31   :  { %326 = vmatpush.bf16.msra.mxu2 %v732_v18  ;;  %340 = vmatpush.bf16.msra.mxu3 %v736_v22  ;;  %v1013_v53 = vld [vmem:[#allocation8 + $0x98] sm:$0xff]  ;;  %v1003_v56 = vld [vmem:[#allocation8 + $0x48] sm:$0xff]  ;;  %v1012_v57 = vld [vmem:[#allocation8 + $0x90] sm:$0xff] }
  0x32   :  { %v1021_v54 = vld [vmem:[#allocation8 + $0xd8] sm:$0xff]  ;;  %v1020_v58 = vld [vmem:[#allocation8 + $0xd0] sm:$0xff]  ;;  %v994_v59 = vld [vmem:[#allocation8] sm:$0xff] }
  0x33   :  { %299 = vmatpush.bf16.msra.mxu0 %v708_v28  ;;  %v1002_v60 = vld [vmem:[#allocation8 + $0x40] sm:$0xff]  ;;  %v1011_v61 = vld [vmem:[#allocation8 + $0x88] sm:$0xff]  ;;  %v116_v1 = vld [vmem:[#allocation7] sm:$0xf] }
  0x34   :  { %313 = vmatpush.bf16.msra.mxu1 %v712_v29  ;;  %v1019_v62 = vld [vmem:[#allocation8 + $0xc8] sm:$0xff]  ;;  %v1010_v63 = vld [vmem:[#allocation8 + $0x80] sm:$0xff]  ;;  %v118_v3 = vperm.slane %v116_v1, 0  ;;  %v119_v5 = vperm.slane %v116_v1, 1  ;;  %v120_v15 = vperm.slane %v116_v1, 2  ;;  %v121_v17 = vperm.slane %v116_v1, 3 }
  0x35   :  { %327 = vmatpush.bf16.msra.mxu2 %v716_v30  ;;  %341 = vmatpush.bf16.msra.mxu3 %v720_v31  ;;  %v1018_v0 = vld [vmem:[#allocation8 + $0xc0] sm:$0xff] }
  0x36   :  { %300 = vmatmul.bf16.vlgmr.msra.gmra.mxu0 %v961_v33 }
  0x37   :  { %620 = vmatpush.bf16.msrb.mxu0 %v1001_v32  ;;  %314 = vmatmul.bf16.vlgmr.msra.gmra.mxu1 %v961_v33 }
  0x38   :  { %634 = vmatpush.bf16.msrb.mxu1 %v1009_v34  ;;  %328 = vmatmul.bf16.vlgmr.msra.gmra.mxu2 %v961_v33 }
  0x39   :  { %342 = vmatmul.bf16.vlgmr.msra.gmra.mxu3 %v961_v33  ;;  %648 = vmatpush.bf16.msrb.mxu2 %v1017_v35 }
  0x3a   :  { %662 = vmatpush.bf16.msrb.mxu3 %v1025_v37 }
  0x3b   :  { %621 = vmatpush.bf16.msrb.mxu0 %v1000_v36  ;;  %v1040_v36 = vld [vmem:[%s1239_s4] ss:$0 sm:$0xff] }
  0x3c   :  { %635 = vmatpush.bf16.msrb.mxu1 %v1008_v38 }
  0x3d   :  { %649 = vmatpush.bf16.msrb.mxu2 %v1016_v39 }
  0x3e   :  { %663 = vmatpush.bf16.msrb.mxu3 %v1024_v41 }
  0x3f   :  { %622 = vmatpush.bf16.msrb.mxu0 %v999_v40 }
  0x40   :  { %636 = vmatpush.bf16.msrb.mxu1 %v1007_v42 }
  0x41   :  { %650 = vmatpush.bf16.msrb.mxu2 %v1015_v43 }
  0x42   :  { %664 = vmatpush.bf16.msrb.mxu3 %v1023_v45 }
  0x43   :  { %623 = vmatpush.bf16.msrb.mxu0 %v998_v44 }
  0x44   :  { %637 = vmatpush.bf16.msrb.mxu1 %v1006_v46 }
  0x45   :  { %651 = vmatpush.bf16.msrb.mxu2 %v1014_v49 }
  0x46   :  { %665 = vmatpush.bf16.msrb.mxu3 %v1022_v50 }
  0x47   :  { %624 = vmatpush.bf16.msrb.mxu0 %v997_v47 }
  0x48   :  { %638 = vmatpush.bf16.msrb.mxu1 %v1005_v48 }
  0x49   :  { %652 = vmatpush.bf16.msrb.mxu2 %v1013_v53 }
  0x4a   :  { %666 = vmatpush.bf16.msrb.mxu3 %v1021_v54 }
  0x4b   :  { %625 = vmatpush.bf16.msrb.mxu0 %v996_v51 }
  0x4c   :  { %639 = vmatpush.bf16.msrb.mxu1 %v1004_v52 }
  0x4d   :  { %653 = vmatpush.bf16.msrb.mxu2 %v1012_v57 }
  0x4e   :  { %667 = vmatpush.bf16.msrb.mxu3 %v1020_v58 }
  0x4f   :  { %626 = vmatpush.bf16.msrb.mxu0 %v995_v55 }
  0x50   :  { %640 = vmatpush.bf16.msrb.mxu1 %v1003_v56 }
  0x51   :  { %654 = vmatpush.bf16.msrb.mxu2 %v1011_v61 }
  0x52   :  { %668 = vmatpush.bf16.msrb.mxu3 %v1019_v62 }
  0x53   :  { %627 = vmatpush.bf16.msrb.mxu0 %v994_v59 }
  0x54   :  { %641 = vmatpush.bf16.msrb.mxu1 %v1002_v60 }
  0x55   :  { %655 = vmatpush.bf16.msrb.mxu2 %v1010_v63 }
  0x56   :  { %669 = vmatpush.bf16.msrb.mxu3 %v1018_v0 }
  0xb3   :  { %v301_v2 = vpop.f32.mrf.mxu0 }
  0xb4   :  { %v315_v4 = vpop.f32.mrf.mxu1  ;;  %v302_v6 = vadd.f32 %v301_v2, %v118_v3 }
  0xb5   :  { %v316_v7 = vadd.f32 %v315_v4, %v119_v5 }
  0xb6   :  { %v348_v11 = vmax.f32 %v302_v6, 0.0 }
  0xb7   :  { %v349_v14 = vmax.f32 %v316_v7, 0.0 }
  0xbb   :  { %v329_v8 = vpop.f32.mrf.mxu2  ;;  %v303_v10 = vpop.f32.mrf.mxu0 }
  0xbc   :  { %v343_v9 = vpop.f32.mrf.mxu3  ;;  %v304_v12 = vadd.f32 %v303_v10, %v118_v3  ;;  %v317_v13 = vpop.f32.mrf.mxu1  ;;  %v330_v21 = vadd.f32 %v329_v8, %v120_v15 }
  0xbd   :  { %v318_v16 = vadd.f32 %v317_v13, %v119_v5  ;;  %v344_v23 = vadd.f32 %v343_v9, %v121_v17 }
  0xbe   :  { %v352_v18 = vmax.f32 %v304_v12, 0.0  ;;  %v350_v28 = vmax.f32 %v330_v21, 0.0 }
  0xbf   :  { %v353_v19 = vmax.f32 %v318_v16, 0.0  ;;  %v351_v30 = vmax.f32 %v344_v23, 0.0 }
  0xc0   :  { %v356_v20 = vpack.c.bf16 %v352_v18, %v348_v11 }
  0xc1   :  { %v357_v22 = vpack.c.bf16 %v353_v19, %v349_v14 }
  0xc2   :  { %628 = vmatmul.bf16.vlgmr.msrb.gmra.mxu0 %v356_v20 }
  0xc3   :  { %v331_v24 = vpop.f32.mrf.mxu2  ;;  %642 = vmatmul.bf16.vlgmr.msrb.gmra.mxu1 %v357_v22 }
  0xc4   :  { %v332_v25 = vadd.f32 %v331_v24, %v120_v15  ;;  %v345_v26 = vpop.f32.mrf.mxu3 }
  0xc5   :  { %v346_v27 = vadd.f32 %v345_v26, %v121_v17 }
  0xc6   :  { %v354_v29 = vmax.f32 %v332_v25, 0.0 }
  0xc7   :  { %v355_v31 = vmax.f32 %v346_v27, 0.0 }
  0xc8   :  { %v358_v32 = vpack.c.bf16 %v354_v29, %v350_v28 }
  0xc9   :  { %v359_v33 = vpack.c.bf16 %v355_v31, %v351_v30 }
  0xca   :  { %656 = vmatmul.bf16.vlgmr.msrb.gmra.mxu2 %v358_v32 }
  0xcb   :  { %670 = vmatmul.bf16.vlgmr.msrb.gmra.mxu3 %v359_v33 }
 0x13f   :  { %v629_v34 = vpop.f32.mrf.mxu0 }
 0x140   :  { %v643_v35 = vpop.f32.mrf.mxu1  ;;  %v630_v39 = vadd.f32 %v1040_v36, %v629_v34 }
 0x142   :  { %v644_v42 = vadd.f32 %v643_v35, %v630_v39 }
 0x147   :  { %v631_v37 = vpop.f32.mrf.mxu0 }
 0x148   :  { %v632_v41 = vadd.f32 %v1040_v36, %v631_v37  ;;  %v645_v43 = vpop.f32.mrf.mxu1 }
 0x14a   :  { %v646_v44 = vadd.f32 %v645_v43, %v632_v41 }
 0x14d   :  { %v657_v38 = vpop.f32.mrf.mxu2 }
 0x14e   :  { %v671_v40 = vpop.f32.mrf.mxu3  ;;  %v658_v45 = vadd.f32 %v657_v38, %v644_v42 }
 0x150   :  { %v672_v49 = vadd.f32 %v671_v40, %v658_v45 }
 0x155   :  { %v659_v46 = vpop.f32.mrf.mxu2 }
 0x156   :  { %v660_v47 = vadd.f32 %v659_v46, %v646_v44  ;;  %v673_v48 = vpop.f32.mrf.mxu3 }
 0x158   :  { %v674_v50 = vadd.f32 %v673_v48, %v660_v47 }
 0x15a   :  { %v1029_v51 = vpack.c.bf16 %v674_v50, %v672_v49 }
 0x15c   :  { %1030 = vst [vmem:[#allocation10] sm:$0xff] %v1029_v51  }
 0x15d   :  { %692 = dma.vmem_to_hbm [thread:$0]  %s685_s16, 128, %s687_s19, [#allocation4], %s1173_s30, %s1173_s30, %s1174_s6  }
 0x15e   :  { %1167 = dma.done.wait [#allocation4], 128  }
 0x15f   :  { %1168 = vsyncadd [#allocation4], 4294967168 }
 0x160   :  { %697 = vsyncpa [#allocation3], 1 }
 0x161   :  { %698 = vsyncpa [#allocation6], 1 }
 0x162   :  { %699 = vsyncpa [#allocation9], 1 }
 0x163   :  { %700 = vsyncpa [#allocation4], 1 }

</bundles_post_ra>
